<compile_context>
chip_gen: v6e
topology: v6e:2x2x1
jax: 0.10.0
libtpu: 0.0.40
codegen_flags: <defaults>
</compile_context>

<pallas_src>
import functools

import jax
import jax.numpy as jnp
from jax.experimental import pallas as pl
from jax.experimental.pallas import tpu as pltpu


def _round_up(n, m):
    return ((n + m - 1) // m) * m


def _ppo_kernel(x_ref, w1_ref, b1_ref, w2a_ref, b2a_ref, w2c_ref, b2c_ref,
                probs_ref, value_ref, *, hidden):
    """One batch tile of the fused actor+critic MLP.

    x_ref     : [TB, obs]    observation tile (streamed over the grid)
    w1_ref    : [obs, 2H]    actor|critic layer-1 weights, concatenated
    b1_ref    : [1, 2H]      actor|critic layer-1 bias, concatenated (f32)
    w2a_ref   : [H, A]       actor head weights (no padding)
    b2a_ref   : [1, A]       actor head bias (f32)
    w2c_ref   : [1, H]       critic head weights as a lane row
    b2c_ref   : [1, 1] SMEM  critic head bias scalar (f32)
    probs_ref : [TB, A]      softmax policy probabilities
    value_ref : [TB, 1]      critic value estimates
    """
    # Fused layer 1 for both heads: a single MXU pass over [obs, 2H], f32 acc.
    h = jnp.tanh(
        jnp.dot(x_ref[...], w1_ref[...], preferred_element_type=jnp.float32)
        + b1_ref[...]
    )
    h_a = h[:, :hidden]          # actor hidden  (lanes 0 .. H-1)
    h_c = h[:, hidden:]          # critic hidden (lanes H .. 2H-1)

    # Actor head + exact softmax (all reductions / exp / divide in f32).
    logits = (
        jnp.dot(h_a.astype(w2a_ref.dtype), w2a_ref[...],
                preferred_element_type=jnp.float32)
        + b2a_ref[...]
    )
    m = jnp.max(logits, axis=-1, keepdims=True)
    e = jnp.exp(logits - m)
    probs_ref[...] = e / jnp.sum(e, axis=-1, keepdims=True)

    # Critic head (output width 1): VPU multiply + XLU lane reduce, no MXU.
    value_ref[...] = (
        jnp.sum(h_c * w2c_ref[...].astype(jnp.float32), axis=-1, keepdims=True)
        + b2c_ref[0, 0]
    )


def ppo_forward(x, params, *, block_b=2048, min_grid_steps=4,
                param_dtype=jnp.float32):
    """Runs actor+critic in a single fused, batch-gridded Pallas kernel.

    Args:
      x: [B, obs_dim] float32 observations.
      params: dict of unpacked weights/biases (see init_params).
      block_b: max batch tile size (rows per grid step).
      min_grid_steps: keep at least this many grid steps when B allows it
        (v7x has 2 TensorCores that shard the "parallel" batch axis).
      param_dtype: jnp.float32 (exact parity) or jnp.bfloat16 (halves HBM
        reads of x / matmul weights; accumulation and softmax stay f32).
    Returns:
      probs: [B, n_actions] softmax policy probabilities (f32).
      value: [B, 1] critic value estimates (f32).
    """
    B, obs_dim = x.shape
    H = params["w1a"].shape[1]
    A = params["w2a"].shape[1]

    # ---- pack weights once (tiny, one-off); no zero-padded halves ----------
    w1 = jnp.concatenate([params["w1a"], params["w1c"]], axis=1)     # [obs, 2H]
    b1 = jnp.concatenate([params["b1a"], params["b1c"]], axis=1)     # [1, 2H]
    w2a = params["w2a"]                                              # [H, A]
    b2a = params["b2a"].reshape(1, A).astype(jnp.float32)            # [1, A]
    w2c = params["w2c"].reshape(1, H)                                # [1, H]
    b2c = params["b2c"].reshape(1, 1).astype(jnp.float32)            # SMEM scalar

    # Matmul operands (and x) optionally in bf16; biases stay f32.
    x = x.astype(param_dtype)
    w1 = w1.astype(param_dtype)
    w2a = w2a.astype(param_dtype)
    w2c = w2c.astype(param_dtype)
    b1 = b1.astype(jnp.float32)

    # ---- batch tiling: big tiles to amortize per-step overhead, but keep ---
    # ---- >= min_grid_steps steps so both v7x TensorCores get work ----------
    tb = _round_up(min(block_b, max(B, 8)), 8)
    cap = _round_up(pl.cdiv(B, min_grid_steps), 8)
    tb = max(8, min(tb, cap))
    Bp = _round_up(B, tb)
    if Bp != B:
        x = jnp.pad(x, ((0, Bp - B), (0, 0)))
    grid = (Bp // tb,)

    def const2d(shape):
        # Weights/biases stay VMEM-resident across all grid steps.
        return pl.BlockSpec(shape, lambda i: (0, 0))

    itemsize = jnp.dtype(param_dtype).itemsize
    cost = pl.CostEstimate(
        flops=int(2 * Bp * (obs_dim * 2 * H + H * A + H)),
        transcendentals=int(Bp * (2 * H + A)),
        bytes_accessed=int(Bp * obs_dim * itemsize            # x read
                           + 4 * Bp * (A + 1)                 # probs + value
                           + itemsize * (obs_dim * 2 * H + H * A + H)
                           + 4 * (2 * H + A + 1)),            # weights/biases
    )

    probs, value = pl.pallas_call(
        functools.partial(_ppo_kernel, hidden=H),
        out_shape=(jax.ShapeDtypeStruct((Bp, A), jnp.float32),
                   jax.ShapeDtypeStruct((Bp, 1), jnp.float32)),
        grid=grid,
        in_specs=[
            pl.BlockSpec((tb, obs_dim), lambda i: (i, 0)),       # x (streamed)
            const2d((obs_dim, 2 * H)),                           # w1
            const2d((1, 2 * H)),                                 # b1
            const2d((H, A)),                                     # w2a
            const2d((1, A)),                                     # b2a
            const2d((1, H)),                                     # w2c
            pl.BlockSpec(memory_space=pltpu.MemorySpace.SMEM),   # b2c scalar
        ],
        out_specs=(pl.BlockSpec((tb, A), lambda i: (i, 0)),      # probs
                   pl.BlockSpec((tb, 1), lambda i: (i, 0))),     # value
        compiler_params=pltpu.CompilerParams(
            dimension_semantics=("parallel",)),
        cost_estimate=cost,
    )(x, w1, b1, w2a, b2a, w2c, b2c)

    return probs[:B], value[:B]


def init_params(key, obs_dim, hidden, n_actions):
    ks = jax.random.split(key, 8)
    s1 = 1.0 / jnp.sqrt(obs_dim)
    s2 = 1.0 / jnp.sqrt(hidden)
    return {
        # actor
        "w1a": (jax.random.normal(ks[0], (obs_dim, hidden)) * s1).astype(jnp.float32),
        "b1a": (jax.random.normal(ks[1], (1, hidden)) * 0.1).astype(jnp.float32),
        "w2a": (jax.random.normal(ks[2], (hidden, n_actions)) * s2).astype(jnp.float32),
        "b2a": (jax.random.normal(ks[3], (1, n_actions)) * 0.1).astype(jnp.float32),
        # critic
        "w1c": (jax.random.normal(ks[4], (obs_dim, hidden)) * s1).astype(jnp.float32),
        "b1c": (jax.random.normal(ks[5], (1, hidden)) * 0.1).astype(jnp.float32),
        "w2c": (jax.random.normal(ks[6], (hidden, 1)) * s2).astype(jnp.float32),
        "b2c": (jax.random.normal(ks[7], (1, 1)) * 0.1).astype(jnp.float32),
    }


def _ref_forward(x, p):
    """Pure-JAX reference for correctness checking."""
    h_a = jnp.tanh(x @ p["w1a"] + p["b1a"])
    logits = h_a @ p["w2a"] + p["b2a"]
    probs = jax.nn.softmax(logits, axis=-1)
    h_c = jnp.tanh(x @ p["w1c"] + p["b1c"])
    value = h_c @ p["w2c"] + p["b2c"]
    return probs, value


if __name__ == "__main__":
    # B deliberately not a multiple of the tile so the pad-and-trim path and a
    # multi-step grid (4 steps after the min_grid_steps cap) are exercised.
    B, OBS, HID, ACT = 250, 16, 32, 4

    key = jax.random.PRNGKey(0)
    k_x, k_p = jax.random.split(key)
    x = jax.random.normal(k_x, (B, OBS), dtype=jnp.float32)
    params = init_params(k_p, OBS, HID, ACT)

    probs_ref, value_ref = _ref_forward(x, params)

    # ---- f32 path: exact parity with the reference ----
    probs, value = ppo_forward(x, params)
    jax.block_until_ready((probs, value))
    assert probs.shape == (B, ACT) and value.shape == (B, 1)
    assert jnp.allclose(probs, probs_ref, atol=1e-4, rtol=1e-4)
    assert jnp.allclose(value, value_ref, atol=1e-4, rtol=1e-4)
    assert jnp.allclose(jnp.sum(probs, axis=-1), 1.0, atol=1e-5)

    # ---- bf16 input/weight path (v6e/v7x HBM/MXU win): looser parity ----
    probs_bf, value_bf = ppo_forward(x, params, param_dtype=jnp.bfloat16)
    jax.block_until_ready((probs_bf, value_bf))
    assert jnp.allclose(probs_bf, probs_ref, atol=5e-2, rtol=5e-2)
    assert jnp.allclose(value_bf, value_ref, atol=5e-2, rtol=5e-2)

    print("KERNEL_OK")
</pallas_src>

<mosaic_0001>
module attributes {stable_mosaic.version = 11 : i64} {
  func.func @_ppo_kernel(%arg0: i32, %arg1: memref<64x16xf32, #tpu.memory_space<vmem>>, %arg2: memref<16x64xf32, #tpu.memory_space<vmem>>, %arg3: memref<1x64xf32, #tpu.memory_space<vmem>>, %arg4: memref<32x4xf32, #tpu.memory_space<vmem>>, %arg5: memref<1x4xf32, #tpu.memory_space<vmem>>, %arg6: memref<1x32xf32, #tpu.memory_space<vmem>>, %arg7: memref<1x1xf32, #tpu.memory_space<smem>>, %arg8: memref<64x4xf32, #tpu.memory_space<vmem>>, %arg9: memref<64x1xf32, #tpu.memory_space<vmem>>) attributes {dimension_semantics = [#tpu.dimension_semantics<parallel>], iteration_bounds = array<i64: 4>, scalar_prefetch = 0 : i64, scratch_operands = 0 : i64, tpu.core_type = #tpu.core_type<tc>, window_params = [{transform_indices = @transform_0, window_bounds = array<i64: 64, 16>}, {pipeline_mode = #tpu.pipeline_mode<synchronous>, transform_indices = @transform_1, window_bounds = array<i64: 16, 64>}, {pipeline_mode = #tpu.pipeline_mode<synchronous>, transform_indices = @transform_2, window_bounds = array<i64: 1, 64>}, {pipeline_mode = #tpu.pipeline_mode<synchronous>, transform_indices = @transform_3, window_bounds = array<i64: 32, 4>}, {pipeline_mode = #tpu.pipeline_mode<synchronous>, transform_indices = @transform_4, window_bounds = array<i64: 1, 4>}, {pipeline_mode = #tpu.pipeline_mode<synchronous>, transform_indices = @transform_5, window_bounds = array<i64: 1, 32>}, {transform_indices = @transform_6, window_bounds = array<i64: 1, 1>}, {transform_indices = @transform_7, window_bounds = array<i64: 64, 4>}, {transform_indices = @transform_8, window_bounds = array<i64: 64, 1>}]} {
    %c0 = arith.constant 0 : index
    %c0_0 = arith.constant 0 : index
    %0 = vector.load %arg1[%c0, %c0_0] : memref<64x16xf32, #tpu.memory_space<vmem>>, vector<64x16xf32>
    %c0_1 = arith.constant 0 : index
    %c0_2 = arith.constant 0 : index
    %1 = vector.load %arg2[%c0_1, %c0_2] : memref<16x64xf32, #tpu.memory_space<vmem>>, vector<16x64xf32>
    %cst = arith.constant dense<0.000000e+00> : vector<64x64xf32>
    %2 = tpu.matmul %0, %1, %cst {dimension_numbers = #tpu.dot_dimension_numbers<[1], [0], [0], [1], [0, 0, 1, 1], [], []>} : vector<64x16xf32>, vector<16x64xf32>, vector<64x64xf32> -> vector<64x64xf32>
    %c0_3 = arith.constant 0 : index
    %c0_4 = arith.constant 0 : index
    %3 = vector.load %arg3[%c0_3, %c0_4] : memref<1x64xf32, #tpu.memory_space<vmem>>, vector<1x64xf32>
    %4 = vector.broadcast %3 : vector<1x64xf32> to vector<64x64xf32>
    %5 = arith.addf %2, %4 : vector<64x64xf32>
    %6 = math.tanh %5 : vector<64x64xf32>
    %7 = vector.extract_strided_slice %6 {offsets = [0, 0], sizes = [64, 32], strides = [1, 1]} : vector<64x64xf32> to vector<64x32xf32>
    %8 = vector.extract_strided_slice %6 {offsets = [0, 32], sizes = [64, 32], strides = [1, 1]} : vector<64x64xf32> to vector<64x32xf32>
    %c0_5 = arith.constant 0 : index
    %c0_6 = arith.constant 0 : index
    %9 = vector.load %arg4[%c0_5, %c0_6] : memref<32x4xf32, #tpu.memory_space<vmem>>, vector<32x4xf32>
    %cst_7 = arith.constant dense<0.000000e+00> : vector<64x4xf32>
    %10 = tpu.matmul %7, %9, %cst_7 {dimension_numbers = #tpu.dot_dimension_numbers<[1], [0], [0], [1], [0, 0, 1, 1], [], []>} : vector<64x32xf32>, vector<32x4xf32>, vector<64x4xf32> -> vector<64x4xf32>
    %c0_8 = arith.constant 0 : index
    %c0_9 = arith.constant 0 : index
    %11 = vector.load %arg5[%c0_8, %c0_9] : memref<1x4xf32, #tpu.memory_space<vmem>>, vector<1x4xf32>
    %12 = vector.broadcast %11 : vector<1x4xf32> to vector<64x4xf32>
    %13 = arith.addf %10, %12 : vector<64x4xf32>
    %cst_10 = arith.constant dense<0xFF800000> : vector<64xf32>
    %14 = vector.multi_reduction <maximumf>, %13, %cst_10 [1] : vector<64x4xf32> to vector<64xf32>
    %15 = vector.shape_cast %14 : vector<64xf32> to vector<64x1xf32>
    %16 = vector.broadcast %15 : vector<64x1xf32> to vector<64x4xf32>
    %17 = arith.subf %13, %16 : vector<64x4xf32>
    %18 = math.exp %17 : vector<64x4xf32>
    %cst_11 = arith.constant dense<0.000000e+00> : vector<64xf32>
    %19 = vector.multi_reduction <add>, %18, %cst_11 [1] : vector<64x4xf32> to vector<64xf32>
    %20 = vector.shape_cast %19 : vector<64xf32> to vector<64x1xf32>
    %21 = vector.broadcast %20 : vector<64x1xf32> to vector<64x4xf32>
    %22 = arith.divf %18, %21 : vector<64x4xf32>
    %c0_12 = arith.constant 0 : index
    %c0_13 = arith.constant 0 : index
    %23 = vector.load %arg8[%c0_12, %c0_13] : memref<64x4xf32, #tpu.memory_space<vmem>>, vector<64x4xf32>
    tpu.vector_store %arg8[%c0_12, %c0_13], %22 {strides = array<i32>} : memref<64x4xf32, #tpu.memory_space<vmem>>, vector<64x4xf32>,
    %c0_14 = arith.constant 0 : index
    %c0_15 = arith.constant 0 : index
    %24 = vector.load %arg6[%c0_14, %c0_15] : memref<1x32xf32, #tpu.memory_space<vmem>>, vector<1x32xf32>
    %25 = vector.broadcast %24 : vector<1x32xf32> to vector<64x32xf32>
    %26 = arith.mulf %8, %25 : vector<64x32xf32>
    %cst_16 = arith.constant dense<0.000000e+00> : vector<64xf32>
    %27 = vector.multi_reduction <add>, %26, %cst_16 [1] : vector<64x32xf32> to vector<64xf32>
    %28 = vector.shape_cast %27 : vector<64xf32> to vector<64x1xf32>
    %c0_17 = arith.constant 0 : index
    %c0_18 = arith.constant 0 : index
    %29 = memref.load %arg7[%c0_17, %c0_18] : memref<1x1xf32, #tpu.memory_space<smem>>
    %30 = vector.broadcast %29 : f32 to vector<64x1xf32>
    %31 = arith.addf %28, %30 : vector<64x1xf32>
    %c0_19 = arith.constant 0 : index
    %c0_20 = arith.constant 0 : index
    %32 = vector.load %arg9[%c0_19, %c0_20] : memref<64x1xf32, #tpu.memory_space<vmem>>, vector<64x1xf32>
    tpu.vector_store %arg9[%c0_19, %c0_20], %31 {strides = array<i32>} : memref<64x1xf32, #tpu.memory_space<vmem>>, vector<64x1xf32>,
    return
  }
  func.func @transform_0(%arg0: i32) -> (i32, i32) {
    %c0_i32 = arith.constant 0 : i32
    %c0_i32_0 = arith.constant 0 : i32
    return %arg0, %c0_i32 : i32, i32
  }
  func.func @transform_1(%arg0: i32) -> (i32, i32) {
    %c0_i32 = arith.constant 0 : i32
    %c0_i32_0 = arith.constant 0 : i32
    %c0_i32_1 = arith.constant 0 : i32
    return %c0_i32, %c0_i32_0 : i32, i32
  }
  func.func @transform_2(%arg0: i32) -> (i32, i32) {
    %c0_i32 = arith.constant 0 : i32
    %c0_i32_0 = arith.constant 0 : i32
    %c0_i32_1 = arith.constant 0 : i32
    return %c0_i32, %c0_i32_0 : i32, i32
  }
  func.func @transform_3(%arg0: i32) -> (i32, i32) {
    %c0_i32 = arith.constant 0 : i32
    %c0_i32_0 = arith.constant 0 : i32
    %c0_i32_1 = arith.constant 0 : i32
    return %c0_i32, %c0_i32_0 : i32, i32
  }
  func.func @transform_4(%arg0: i32) -> (i32, i32) {
    %c0_i32 = arith.constant 0 : i32
    %c0_i32_0 = arith.constant 0 : i32
    %c0_i32_1 = arith.constant 0 : i32
    return %c0_i32, %c0_i32_0 : i32, i32
  }
  func.func @transform_5(%arg0: i32) -> (i32, i32) {
    %c0_i32 = arith.constant 0 : i32
    %c0_i32_0 = arith.constant 0 : i32
    %c0_i32_1 = arith.constant 0 : i32
    return %c0_i32, %c0_i32_0 : i32, i32
  }
  func.func @transform_6(%arg0: i32) -> (i32, i32) {
    %c0_i32 = arith.constant 0 : i32
    %c0_i32_0 = arith.constant 0 : i32
    %c0_i32_1 = arith.constant 0 : i32
    return %c0_i32, %c0_i32_0 : i32, i32
  }
  func.func @transform_7(%arg0: i32) -> (i32, i32) {
    %c0_i32 = arith.constant 0 : i32
    %c0_i32_0 = arith.constant 0 : i32
    return %arg0, %c0_i32 : i32, i32
  }
  func.func @transform_8(%arg0: i32) -> (i32, i32) {
    %c0_i32 = arith.constant 0 : i32
    %c0_i32_0 = arith.constant 0 : i32
    return %arg0, %c0_i32 : i32, i32
  }
}

</mosaic_0001>

<bundles_post_ra>
// kernel: tpu_custom_call.1
= control target key start
LH: loop header
LB: loop body
LE: loop exit
PB: predicated region body
PF: predicated region fallthrough
CT: control target
= control target key end

     0   :  { %s1105_s29 = smov 0   ;;  %s1273_s0 = inlined_call_operand.vmem [shape: f32[256,16], index: 0, kind: input, shape index: {}]   ;;  %s1274_s1 = inlined_call_operand.vmem [shape: f32[16,64], index: 1, kind: input, shape index: {}]   ;;  %s1275_s2 = inlined_call_operand.vmem [shape: f32[1,64], index: 2, kind: input, shape index: {}]   ;;  %s1276_s3 = inlined_call_operand.vmem [shape: f32[32,4], index: 3, kind: input, shape index: {}]   ;;  %s1277_s4 = inlined_call_operand.vmem [shape: f32[1,4], index: 4, kind: input, shape index: {}]   ;;  %s1278_s5 = inlined_call_operand.vmem [shape: f32[1,32], index: 5, kind: input, shape index: {}]   ;;  %s1279_s6 = inlined_call_operand.<no memory space> [shape: f32[1,1], index: 6, kind: input, shape index: {}]   ;;  %s1280_s7 = inlined_call_operand.vmem [shape: f32[256,4], index: 7, kind: output, shape index: {0}]   ;;  %s1281_s8 = inlined_call_operand.vmem [shape: f32[256,1], index: 8, kind: output, shape index: {1}]  }
   0x1   :  { %14 = sst [smem:[#allocation2]] %s1279_s6 }
   0x2 LB: > { %s899_s30 = sadd.s32 4294967295, %s1053_s29   ;;  %p903_p0 = scmp.ge.s32.totalorder %s1053_s29, 1  ;;  %s1053_s29 = sphi %s1105_s29, %s20_s29  }
   0x3   : > { %p267_p1 = scmp.lt.s32.totalorder %s1053_s29, 5 }
   0x5   : > { %p268_p2 = pnand %p903_p0, %p267_p1 }
   0x6   : > { %s904_s12 = sshll.u32 (!%p268_p2), %s899_s30, 3  ;;  %s1055_s15 = smov (!%p268_p2), 32  }
   0x7   : > { %271 = sbr.rel (%p268_p2) target bundleno = 816 (0x330), region = 48  ;;  %p307_p3 = scmp.lt.s32.totalorder (!%p268_p2), %s904_s12, 31 }
   0x8   : > { %s1056_s6 = smov (!%p268_p2), 96   ;;  %s790_s14 = sld [smem:[#allocation2]] (!%p268_p2) }
   0xc   : > { %v333_v0 = vld [vmem:[%s1274_s1 + $0x8] sm:$0xff]  ;;  %v332_v1 = vld [vmem:[%s1274_s1] sm:$0xff]  ;;  %s1283_s12 = smov (!%p307_p3, %s904_s12), 31  ;;  %vm341_vm0 = vcmask 130048   ;;  %v482_v11 = vld [vmem:[%s1276_s3 + $0x18] sm:$0xff]  ;;  %vm490_vm1 = vcmask 261120  }
   0xd   : > { %v928_v2 = vld [vmem:[%s1278_s5] ss:$0 sm:$0xff]  ;;  %953 = vmatprep.subr.mxu0 %v333_v0  ;;  %s1122_s16 = sshll.u32 %s1283_s12, 3  ;;  %v481_v12 = vld [vmem:[%s1276_s3 + $0x10] sm:$0xff]  ;;  %969 = vmatprep.subr.mxu1 %v482_v11  ;;  %v480_v13 = vld [vmem:[%s1276_s3 + $0x8] sm:$0xff]  ;;  %vm620_vm2 = vcmask 31744  }
   0xe   : > { %954 = vmatpush3.msra.mxu0 %v333_v0  ;;  %723 = vrot.lane.b32.xlu0 %v928_v2, %s1055_s15  ;;  %s310_s19 = scalar_lea.vmem %s1273_s0, %s1122_s16  ;;  %v479_v14 = vld [vmem:[%s1276_s3] sm:$0xff]  ;;  %s1222_s13 = scalar_lea.vmem %s1280_s7, %s1122_s16  ;;  %vm800_vm3 = vcmask 7168  }
   0xf   : > { %955 = vmatprep.subr.mxu0 %v332_v1  ;;  %v324_v3 = vld [vmem:[%s310_s19] sm:$0xff]  ;;  %v325_v4 = vld [vmem:[%s310_s19 + $0x8] sm:$0xff]  ;;  %v326_v5 = vld [vmem:[%s310_s19 + $0x10] sm:$0xff]  ;;  %970 = vmatpush3.msra.mxu1 %v482_v11  ;;  %s1238_s18 = scalar_lea.vmem %s1281_s8, %s1122_s16 }
  0x10   : > { %956 = vmatpush3.msra.mxu0 %v332_v1  ;;  %957 = vmatprep.mubr.msk.f32.mxu0 %vm341_vm0, %v324_v3  ;;  %v327_v6 = vld [vmem:[%s310_s19 + $0x18] sm:$0xff]  ;;  %v328_v7 = vld [vmem:[%s310_s19 + $0x20] sm:$0xff]  ;;  %v329_v8 = vld [vmem:[%s310_s19 + $0x28] sm:$0xff] }
  0x11   : > { %958 = vmatmul.mubr.msk.f32.vlgmr.msra.gmra.mxu0 %vm341_vm0, %v325_v4  ;;  %v330_v9 = vld [vmem:[%s310_s19 + $0x30] sm:$0xff]  ;;  %v331_v10 = vld [vmem:[%s310_s19 + $0x38] sm:$0xff]  ;;  %971 = vmatprep.subr.mxu1 %v481_v12  ;;  %v910_v15 = vld [vmem:[%s1275_s2] ss:$0 sm:$0xff] }
  0x12   : > { %960 = vmatprep.mubr.msk.f32.mxu0 %vm341_vm0, %v326_v5  ;;  %972 = vmatpush3.msra.mxu1 %v481_v12  ;;  %v919_v40 = vld [vmem:[%s1277_s4] ss:$0 sm:$0xff] }
  0x13   : > { %973 = vmatprep.subr.mxu1 %v480_v13 }
  0x14   : > { %974 = vmatpush3.msra.mxu1 %v480_v13 }
  0x15   : > { %961 = vmatmul.mubr.msk.f32.gmra.mxu0 %vm341_vm0, %v327_v6  ;;  %975 = vmatprep.subr.mxu1 %v479_v14 }
  0x16   : > { %963 = vmatprep.mubr.msk.f32.mxu0 %vm341_vm0, %v328_v7  ;;  %976 = vmatpush3.msra.mxu1 %v479_v14 }
  0x19   : > { %964 = vmatmul.mubr.msk.f32.gmra.mxu0 %vm341_vm0, %v329_v8 }
  0x1a   : > { %966 = vmatprep.mubr.msk.f32.mxu0 %vm341_vm0, %v330_v9 }
  0x1d   : > { %967 = vmatmul.mubr.msk.f32.gmra.mxu0 %vm341_vm0, %v331_v10 }
  0x80   : > { %v724_v47 = vpop.permute.xlu0 %723 }
  0xd1   : > { %v959_v16 = vpop.f32.mrf.mxu0 }
  0xd2   : > { %v438_v17 = vadd.f32 %v959_v16, %v910_v15 }
  0xd3   : > { %v432_v18 = vpop.f32.mrf.mxu0 }
  0xd4   : > { %v433_v19 = vadd.f32 %v910_v15, %v432_v18 }
  0xd5   : > { %v962_v20 = vpop.f32.mrf.mxu0 }
  0xd6   : > { %999 = vtanh.f32 %v433_v19  ;;  %v448_v21 = vadd.f32 %v962_v20, %v910_v15 }
  0xd7   : > { %1001 = vtanh.f32 %v438_v17  ;;  %v442_v22 = vpop.f32.mrf.mxu0 }
  0xd8   : > { %v443_v23 = vadd.f32 %v910_v15, %v442_v22  ;;  %1003 = vtanh.f32 %v448_v21 }
  0xd9   : > { %v965_v24 = vpop.f32.mrf.mxu0 }
  0xda   : > { %1005 = vtanh.f32 %v443_v23  ;;  %v458_v25 = vadd.f32 %v965_v24, %v910_v15 }
  0xdb   : > { %v452_v26 = vpop.f32.mrf.mxu0 }
  0xdc   : > { %v453_v27 = vadd.f32 %v910_v15, %v452_v26  ;;  %1007 = vtanh.f32 %v458_v25 }
  0xdd   : > { %v968_v28 = vpop.f32.mrf.mxu0 }
  0xde   : > { %1009 = vtanh.f32 %v453_v27  ;;  %v468_v29 = vadd.f32 %v968_v28, %v910_v15 }
  0xdf   : > { %v462_v30 = vpop.f32.mrf.mxu0 }
  0xe0   : > { %v463_v31 = vadd.f32 %v910_v15, %v462_v30  ;;  %1011 = vtanh.f32 %v468_v29 }
  0xe2   : > { %1013 = vtanh.f32 %v463_v31 }
  0xe3   : > { %v1000_v32 = vpop.eup %999 }
  0xe4   : > { %v1002_v33 = vpop.eup %1001  ;;  %977 = vmatprep.mubr.msk.f32.mxu1 %vm490_vm1, %v1000_v32  ;;  %v726_v48 = vmul.f32 %v1000_v32, %v724_v47 }
  0xe5   : > { %978 = vmatmul.mubr.msk.f32.vlgmr.msra.gmra.mxu1 %vm490_vm1, %v1002_v33  ;;  %v1004_v34 = vpop.eup %1003  ;;  %v727_v50 = vmul.f32 %v1002_v33, %v724_v47 }
  0xe6   : > { %v729_v7 = vmul.f32 %v1004_v34, %v724_v47 }
  0xe7   : > { %v1006_v35 = vpop.eup %1005 }
  0xe8   : > { %980 = vmatprep.mubr.msk.f32.mxu1 %vm490_vm1, %v1006_v35  ;;  %v728_v49 = vmul.f32 %v1006_v35, %v724_v47 }
  0xe9   : > { %981 = vmatmul.mubr.msk.f32.gmra.mxu1 %vm490_vm1, %v1004_v34  ;;  %v1008_v36 = vpop.eup %1007 }
  0xea   : > { %v731_v51 = vmul.f32 %v1008_v36, %v724_v47 }
  0xeb   : > { %v1010_v37 = vpop.eup %1009 }
  0xec   : > { %983 = vmatprep.mubr.msk.f32.mxu1 %vm490_vm1, %v1010_v37  ;;  %v730_v8 = vmul.f32 %v1010_v37, %v724_v47 }
  0xed   : > { %984 = vmatmul.mubr.msk.f32.gmra.mxu1 %vm490_vm1, %v1008_v36  ;;  %v1012_v38 = vpop.eup %1011 }
  0xee   : > { %v733_v52 = vmul.f32 %v1012_v38, %v724_v47 }
  0xef   : > { %v1014_v39 = vpop.eup %1013 }
  0xf0   : > { %986 = vmatprep.mubr.msk.f32.mxu1 %vm490_vm1, %v1014_v39  ;;  %v732_v9 = vmul.f32 %v1014_v39, %v724_v47 }
  0xf1   : > { %987 = vmatmul.mubr.msk.f32.gmra.mxu1 %vm490_vm1, %v1012_v38 }
 0x1a5   : > { %v979_v41 = vpop.f32.mrf.mxu1 }
 0x1a6   : > { %v587_v42 = vadd.f32 %v979_v41, %v919_v40 }
 0x1a7   : > { %v581_v43 = vpop.f32.mrf.mxu1 }
 0x1a8   : > { %v582_v44 = vadd.f32 %v919_v40, %v581_v43  ;;  %v624_v45 = vsel %vm620_vm2, %v587_v42, -inf }
 0x1a9   : > { %625 = vmax.xlane.f32.xlu1 %v624_v45  ;;  %v982_v53 = vpop.f32.mrf.mxu1 }
 0x1aa   : > { %v621_v46 = vsel %vm620_vm2, %v582_v44, -inf  ;;  %v597_v54 = vadd.f32 %v982_v53, %v919_v40 }
 0x1ab   : > { %622 = vmax.xlane.f32.xlu0 %v621_v46  ;;  %v591_v55 = vpop.f32.mrf.mxu1 }
 0x1ac   : > { %v592_v56 = vadd.f32 %v919_v40, %v591_v55  ;;  %v630_v57 = vsel %vm620_vm2, %v597_v54, -inf }
 0x1ad   : > { %v985_v58 = vpop.f32.mrf.mxu1 }
 0x1ae   : > { %v607_v59 = vadd.f32 %v985_v58, %v919_v40  ;;  %v627_v60 = vsel %vm620_vm2, %v592_v56, -inf }
 0x1af   : > { %v601_v61 = vpop.f32.mrf.mxu1 }
 0x1b0   : > { %v602_v62 = vadd.f32 %v919_v40, %v601_v61  ;;  %v636_v63 = vsel %vm620_vm2, %v607_v59, -inf }
 0x1b1   : > { %v988_v0 = vpop.f32.mrf.mxu1 }
 0x1b2   : > { %v617_v1 = vadd.f32 %v988_v0, %v919_v40  ;;  %v633_v2 = vsel %vm620_vm2, %v602_v62, -inf }
 0x1b3   : > { %v611_v3 = vpop.f32.mrf.mxu1 }
 0x1b4   : > { %v612_v4 = vadd.f32 %v919_v40, %v611_v3  ;;  %v642_v5 = vsel %vm620_vm2, %v617_v1, -inf }
 0x1b6   : > { %v639_v6 = vsel %vm620_vm2, %v612_v4, -inf }
 0x1ba   : > { %742 = vrot.lane.b32.xlu1 %v726_v48, %s1056_s6 }
 0x1be   : > { %746 = vrot.lane.b32.xlu1 %v728_v49, %s1056_s6 }
 0x1c1   : > { %744 = vrot.lane.b32.xlu0 %v727_v50, %s1056_s6 }
 0x1c5   : > { %752 = vrot.lane.b32.xlu0 %v731_v51, %s1056_s6 }
 0x1c9   : > { %756 = vrot.lane.b32.xlu0 %v733_v52, %s1056_s6 }
 0x1e2   : > { %631 = vmax.xlane.f32.xlu1 %v630_v57 }
 0x1e6   : > { %628 = vmax.xlane.f32.xlu1 %v627_v60 }
 0x1ea   : > { %637 = vmax.xlane.f32.xlu1 %v636_v63 }
 0x1ee   : > { %634 = vmax.xlane.f32.xlu1 %v633_v2 }
 0x1f2   : > { %643 = vmax.xlane.f32.xlu1 %v642_v5 }
 0x1f6   : > { %640 = vmax.xlane.f32.xlu1 %v639_v6 }
 0x207   : > { %748 = vrot.lane.b32.xlu1 %v729_v7, %s1056_s6 }
 0x20b   : > { %750 = vrot.lane.b32.xlu1 %v730_v8, %s1056_s6 }
 0x20f   : > { %754 = vrot.lane.b32.xlu1 %v732_v9, %s1056_s6 }
 0x232   : > { %v626_v10 = vpop.xlane.xlu1 %625 }
 0x233   : > { %v646_v11 = vsub.f32 %v587_v42, %v626_v10 }
 0x234   : > { %v623_v12 = vpop.xlane.xlu0 %622 }
 0x235   : > { %v655_v13 = vmul.f32 1.442695, %v646_v11  ;;  %v645_v14 = vsub.f32 %v582_v44, %v623_v12 }
 0x236   : > { %v743_v20 = vpop.permute.xlu1 %742 }
 0x237   : > { %1015 = vpow2.f32 %v655_v13  ;;  %v653_v15 = vmul.f32 1.442695, %v645_v14 }
 0x238   : > { %v745_v50 = vpop.permute.xlu0 %744 }
 0x239   : > { %1017 = vpow2.f32 %v653_v15  ;;  %v769_v53 = vsel %vm490_vm1, %v745_v50, 0.0 }
 0x23a   : > { %v747_v21 = vpop.permute.xlu1 %746 }
 0x23c   : > { %v753_v55 = vpop.permute.xlu0 %752 }
 0x23d   : > { %v781_v60 = vsel %vm490_vm1, %v753_v55, 0.0 }
 0x240   : > { %v757_v61 = vpop.permute.xlu0 %756 }
 0x241   : > { %v787_v63 = vsel %vm490_vm1, %v757_v61, 0.0 }
 0x244   : > { %v1178_v16 = vpop.eup %1015 }
 0x245   : > { %v672_v17 = vsel %vm620_vm2, %v1178_v16, 0.0 }
 0x246   : > { %v1182_v18 = vpop.eup %1017  ;;  %673 = vadd.xlane.f32.xlu0 %v672_v17 }
 0x247   : > { %v669_v19 = vsel %vm620_vm2, %v1182_v18, 0.0 }
 0x248   : > { %670 = vadd.xlane.f32.xlu1 %v669_v19 }
 0x26b   : > { %v632_v22 = vpop.xlane.xlu1 %631 }
 0x26c   : > { %v648_v23 = vsub.f32 %v597_v54, %v632_v22 }
 0x26e   : > { %v659_v24 = vmul.f32 1.442695, %v648_v23 }
 0x26f   : > { %v629_v25 = vpop.xlane.xlu1 %628 }
 0x270   : > { %1019 = vpow2.f32 %v659_v24  ;;  %v647_v26 = vsub.f32 %v592_v56, %v629_v25  ;;  %v766_v56 = vsel %vm490_vm1, %v743_v20, 0.0 }
 0x272   : > { %v657_v27 = vmul.f32 1.442695, %v647_v26 }
 0x273   : > { %v638_v28 = vpop.xlane.xlu1 %637 }
 0x274   : > { %1021 = vpow2.f32 %v657_v27  ;;  %v650_v29 = vsub.f32 %v607_v59, %v638_v28  ;;  %v772_v59 = vsel %vm490_vm1, %v747_v21, 0.0 }
 0x276   : > { %v663_v30 = vmul.f32 1.442695, %v650_v29 }
 0x277   : > { %v635_v31 = vpop.xlane.xlu1 %634 }
 0x278   : > { %1023 = vpow2.f32 %v663_v30  ;;  %v649_v32 = vsub.f32 %v602_v62, %v635_v31 }
 0x27a   : > { %v661_v33 = vmul.f32 1.442695, %v649_v32 }
 0x27b   : > { %v644_v34 = vpop.xlane.xlu1 %643 }
 0x27c   : > { %1025 = vpow2.f32 %v661_v33  ;;  %v652_v35 = vsub.f32 %v617_v1, %v644_v34 }
 0x27d   : > { %v1186_v36 = vpop.eup %1019 }
 0x27e   : > { %v667_v37 = vmul.f32 1.442695, %v652_v35  ;;  %v678_v38 = vsel %vm620_vm2, %v1186_v36, 0.0 }
 0x27f   : > { %v641_v39 = vpop.xlane.xlu1 %640  ;;  %679 = vadd.xlane.f32.xlu1 %v678_v38 }
 0x280   : > { %1027 = vpow2.f32 %v667_v37  ;;  %v651_v40 = vsub.f32 %v612_v4, %v641_v39 }
 0x281   : > { %v1190_v41 = vpop.eup %1021 }
 0x282   : > { %v665_v42 = vmul.f32 1.442695, %v651_v40  ;;  %v675_v43 = vsel %vm620_vm2, %v1190_v41, 0.0 }
 0x283   : > { %676 = vadd.xlane.f32.xlu0 %v675_v43  ;;  %v749_v54 = vpop.permute.xlu1 %748 }
 0x284   : > { %1029 = vpow2.f32 %v665_v42  ;;  %v775_v57 = vsel %vm490_vm1, %v749_v54, 0.0 }
 0x285   : > { %v1194_v44 = vpop.eup %1023 }
 0x286   : > { %v684_v45 = vsel %vm620_vm2, %v1194_v44, 0.0 }
 0x287   : > { %685 = vadd.xlane.f32.xlu1 %v684_v45  ;;  %v751_v58 = vpop.permute.xlu1 %750 }
 0x288   : > { %v778_v62 = vsel %vm490_vm1, %v751_v58, 0.0 }
 0x289   : > { %v1198_v46 = vpop.eup %1025 }
 0x28a   : > { %v681_v47 = vsel %vm620_vm2, %v1198_v46, 0.0 }
 0x28b   : > { %682 = vadd.xlane.f32.xlu0 %v681_v47  ;;  %v755_v0 = vpop.permute.xlu1 %754 }
 0x28c   : > { %v784_v1 = vsel %vm490_vm1, %v755_v0, 0.0 }
 0x28d   : > { %v1202_v48 = vpop.eup %1027 }
 0x28e   : > { %v690_v49 = vsel %vm620_vm2, %v1202_v48, 0.0 }
 0x28f   : > { %691 = vadd.xlane.f32.xlu1 %v690_v49 }
 0x291   : > { %v1206_v51 = vpop.eup %1029 }
 0x292   : > { %v687_v52 = vsel %vm620_vm2, %v1206_v51, 0.0 }
 0x293   : > { %688 = vadd.xlane.f32.xlu0 %v687_v52  ;;  %770 = vadd.xlane.f32.xlu1 %v769_v53 }
 0x297   : > { %767 = vadd.xlane.f32.xlu0 %v766_v56  ;;  %776 = vadd.xlane.f32.xlu1 %v775_v57 }
 0x29b   : > { %773 = vadd.xlane.f32.xlu0 %v772_v59  ;;  %782 = vadd.xlane.f32.xlu1 %v781_v60 }
 0x29f   : > { %779 = vadd.xlane.f32.xlu0 %v778_v62  ;;  %788 = vadd.xlane.f32.xlu1 %v787_v63 }
 0x2a3   : > { %785 = vadd.xlane.f32.xlu0 %v784_v1 }
 0x2cf   : > { %v674_v2 = vpop.xlane.xlu0 %673 }
 0x2d0   : > { %1031 = vrcp.f32 %v674_v2 }
 0x2d1   : > { %v671_v3 = vpop.xlane.xlu1 %670 }
 0x2d2   : > { %1033 = vrcp.f32 %v671_v3 }
 0x2dd   : > { %v1032_v4 = vpop.eup %1031 }
 0x2de   : > { %v696_v5 = vmul.f32 %v1032_v4, %v1178_v16  ;;  %v791_v16 = vstv %s790_s14 }
 0x2df   : > { %v1034_v6 = vpop.eup %1033 }
 0x2e0   : > { %710 = vst.msk [vmem:[%s1222_s13 + $0x8] sm:$0xff] %vm620_vm2, %v696_v5  ;;  %v694_v7 = vmul.f32 %v1034_v6, %v1182_v18 }
 0x2e2   : > { %709 = vst.msk [vmem:[%s1222_s13] sm:$0xff] %vm620_vm2, %v694_v7 }
 0x308   : > { %v680_v8 = vpop.xlane.xlu1 %679 }
 0x309   : > { %1035 = vrcp.f32 %v680_v8 }
 0x30c   : > { %v677_v9 = vpop.xlane.xlu0 %676 }
 0x30d   : > { %1037 = vrcp.f32 %v677_v9 }
 0x310   : > { %v686_v10 = vpop.xlane.xlu1 %685 }
 0x311   : > { %1039 = vrcp.f32 %v686_v10 }
 0x314   : > { %v683_v11 = vpop.xlane.xlu0 %682 }
 0x315   : > { %1041 = vrcp.f32 %v683_v11 }
 0x316   : > { %v1036_v12 = vpop.eup %1035 }
 0x317   : > { %v700_v13 = vmul.f32 %v1036_v12, %v1186_v36 }
 0x318   : > { %v692_v14 = vpop.xlane.xlu1 %691 }
 0x319   : > { %712 = vst.msk [vmem:[%s1222_s13 + $0x18] sm:$0xff] %vm620_vm2, %v700_v13  ;;  %1043 = vrcp.f32 %v692_v14 }
 0x31a   : > { %v1038_v15 = vpop.eup %1037 }
 0x31b   : > { %v698_v17 = vmul.f32 %v1038_v15, %v1190_v41 }
 0x31c   : > { %v771_v18 = vpop.xlane.xlu1 %770  ;;  %v689_v19 = vpop.xlane.xlu0 %688 }
 0x31d   : > { %711 = vst.msk [vmem:[%s1222_s13 + $0x10] sm:$0xff] %vm620_vm2, %v698_v17  ;;  %v793_v20 = vadd.f32 %v791_v16, %v771_v18  ;;  %1045 = vrcp.f32 %v689_v19 }
 0x31e   : > { %v1040_v21 = vpop.eup %1039 }
 0x31f   : > { %v704_v22 = vmul.f32 %v1040_v21, %v1194_v44  ;;  %802 = vst.msk [vmem:[%s1238_s18 + $0x8] sm:$0xff] %vm800_vm3, %v793_v20 }
 0x320   : > { %v777_v23 = vpop.xlane.xlu1 %776  ;;  %v768_v24 = vpop.xlane.xlu0 %767 }
 0x321   : > { %714 = vst.msk [vmem:[%s1222_s13 + $0x28] sm:$0xff] %vm620_vm2, %v704_v22  ;;  %v795_v25 = vadd.f32 %v791_v16, %v777_v23  ;;  %v792_v26 = vadd.f32 %v791_v16, %v768_v24 }
 0x322   : > { %v1042_v27 = vpop.eup %1041 }
 0x323   : > { %v702_v28 = vmul.f32 %v1042_v27, %v1198_v46  ;;  %804 = vst.msk [vmem:[%s1238_s18 + $0x18] sm:$0xff] %vm800_vm3, %v795_v25  ;;  %801 = vst.msk [vmem:[%s1238_s18] sm:$0xff] %vm800_vm3, %v792_v26 }
 0x324   : > { %v783_v29 = vpop.xlane.xlu1 %782  ;;  %v774_v30 = vpop.xlane.xlu0 %773 }
 0x325   : > { %713 = vst.msk [vmem:[%s1222_s13 + $0x20] sm:$0xff] %vm620_vm2, %v702_v28  ;;  %v797_v31 = vadd.f32 %v791_v16, %v783_v29  ;;  %v794_v32 = vadd.f32 %v791_v16, %v774_v30 }
 0x326   : > { %v1044_v33 = vpop.eup %1043 }
 0x327   : > { %v708_v34 = vmul.f32 %v1044_v33, %v1202_v48  ;;  %806 = vst.msk [vmem:[%s1238_s18 + $0x28] sm:$0xff] %vm800_vm3, %v797_v31  ;;  %803 = vst.msk [vmem:[%s1238_s18 + $0x10] sm:$0xff] %vm800_vm3, %v794_v32 }
 0x328   : > { %v789_v35 = vpop.xlane.xlu1 %788  ;;  %v780_v36 = vpop.xlane.xlu0 %779 }
 0x329   : > { %716 = vst.msk [vmem:[%s1222_s13 + $0x38] sm:$0xff] %vm620_vm2, %v708_v34  ;;  %v799_v37 = vadd.f32 %v791_v16, %v789_v35  ;;  %v796_v38 = vadd.f32 %v791_v16, %v780_v36 }
 0x32a   : > { %v1046_v39 = vpop.eup %1045 }
 0x32b   : > { %v706_v40 = vmul.f32 %v1046_v39, %v1206_v51  ;;  %808 = vst.msk [vmem:[%s1238_s18 + $0x38] sm:$0xff] %vm800_vm3, %v799_v37  ;;  %805 = vst.msk [vmem:[%s1238_s18 + $0x20] sm:$0xff] %vm800_vm3, %v796_v38 }
 0x32c   : > { %v786_v41 = vpop.xlane.xlu0 %785 }
 0x32d   : > { %715 = vst.msk [vmem:[%s1222_s13 + $0x30] sm:$0xff] %vm620_vm2, %v706_v40  ;;  %v798_v42 = vadd.f32 %v791_v16, %v786_v41 }
 0x32f   : > { %807 = vst.msk [vmem:[%s1238_s18 + $0x30] sm:$0xff] %vm800_vm3, %v798_v42 }
 0x330 PF: > { %s20_s29 = sadd.s32 1, %s1053_s29  }
 0x331   : > { %p17_p4 = scmp.ge.s32.totalorder %s20_s29, 6  }
 0x333   :  { %19 = sbr.rel (!%p17_p4) target bundleno = 2 (0x2), region = 90 }

</bundles_post_ra>
